<compile_context>
chip_gen: v6e
topology: v6e:2x2x1
jax: 0.10.0
libtpu: 0.0.40
codegen_flags: <defaults>
</compile_context>

<pallas_src>
import jax
import jax.numpy as jnp
from jax.experimental import pallas as pl
from jax.experimental.pallas import tpu as pltpu


D_IN, H1, H2, N_CLS, N_PAD = 28 * 28, 128, 64, 10, 128
_COMPUTE_DTYPE = jnp.bfloat16


def _mlp_kernel(x_ref, w1_ref, b1_ref, w2_ref, b2_ref, w3_ref, b3_ref, o_ref):
    # Cast the streamed f32 x tile to bf16 in VMEM (hidden under the x DMA).
    x = x_ref[...].astype(w1_ref.dtype)
    # fc1 + ReLU (bf16 MXU inputs, f32 accumulation)
    h1 = jnp.dot(x, w1_ref[...], preferred_element_type=jnp.float32)
    h1 = jnp.maximum(h1 + b1_ref[...], 0.0)
    # fc2 + ReLU
    h2 = jnp.dot(h1.astype(w2_ref.dtype), w2_ref[...],
                 preferred_element_type=jnp.float32)
    h2 = jnp.maximum(h2 + b2_ref[...], 0.0)
    # fc3: lane-dense (64 x 128) padded matmul in VMEM, narrow (10-wide) store.
    out = jnp.dot(h2.astype(w3_ref.dtype), w3_ref[...],
                  preferred_element_type=jnp.float32)
    logits = out[:, : o_ref.shape[-1]] + b3_ref[...]
    o_ref[...] = logits.astype(o_ref.dtype)


def _round_up(a, m):
    return (a + m - 1) // m * m


def _cdiv(a, b):
    return (a + b - 1) // b


def prepare_params(params):
    """One-time preprocessing: transpose to (in,out), cast weights to bf16,
    zero-pad fc3 weights to a lane-dense 128-wide MXU output."""
    w1 = params["w1"].T.astype(_COMPUTE_DTYPE)                 # (784, 128)
    w2 = params["w2"].T.astype(_COMPUTE_DTYPE)                 # (128, 64)
    w3 = params["w3"].T.astype(_COMPUTE_DTYPE)                 # (64, 10)
    w3p = jnp.zeros((H2, N_PAD), _COMPUTE_DTYPE).at[:, :N_CLS].set(w3)
    return {
        "w1": w1, "w2": w2, "w3p": w3p,
        "b1": params["b1"].reshape(1, -1).astype(jnp.float32),  # (1, 128)
        "b2": params["b2"].reshape(1, -1).astype(jnp.float32),  # (1, 64)
        "b3": params["b3"].reshape(1, -1).astype(jnp.float32),  # (1, 10)
    }


def digit_classifier_forward(x, prepared, *, tb_max=2048):
    """x: any shape with 784 trailing elements per sample (e.g. (B,1,28,28)).
    prepared: output of prepare_params()."""
    x2d = x.reshape(-1, D_IN)                  # x.view(-1, 784); dtype untouched
    B = x2d.shape[0]

    # Balanced batch tile: minimal padding, >=2 grid steps when B > 8 so the
    # "parallel" batch axis shards across both TensorCores on v7x.
    n_steps = max(_cdiv(B, tb_max), 2 if B > 8 else 1)
    TB = min(_round_up(_cdiv(B, n_steps), 8), _round_up(B, 8))
    grid_n = _cdiv(B, TB)                      # ragged last tile handled by Pallas

    itemsize = jnp.dtype(x2d.dtype).itemsize
    weight_bytes = (D_IN * H1 + H1 * H2 + H2 * N_PAD) * 2 + (H1 + H2 + N_CLS) * 4
    io_bytes = 2 * TB * D_IN * itemsize + 2 * TB * N_CLS * 4      # double buffers
    scratch_bytes = TB * (D_IN * 2 + H1 * 6 + H2 * 6 + N_PAD * 4)  # intermediates
    vmem_limit = int(1.25 * (io_bytes + 2 * weight_bytes + scratch_bytes)) + (2 << 20)
    vmem_limit = max(min(vmem_limit, 48 << 20), 16 << 20)

    flops = 2 * B * (D_IN * H1 + H1 * H2 + H2 * N_PAD)
    bytes_accessed = (
        B * D_IN * itemsize         # x read once, in source dtype
        + weight_bytes              # weights/biases (VMEM resident)
        + B * N_CLS * 4             # narrow f32 logits
    )

    out = pl.pallas_call(
        _mlp_kernel,
        out_shape=jax.ShapeDtypeStruct((B, N_CLS), jnp.float32),
        grid_spec=pltpu.PrefetchScalarGridSpec(
            num_scalar_prefetch=0,
            grid=(grid_n,),
            in_specs=[
                pl.BlockSpec((TB, D_IN), lambda i: (i, 0)),     # x tile (streamed)
                pl.BlockSpec((D_IN, H1), lambda i: (0, 0)),     # w1 (resident)
                pl.BlockSpec((1, H1), lambda i: (0, 0)),        # b1
                pl.BlockSpec((H1, H2), lambda i: (0, 0)),       # w2
                pl.BlockSpec((1, H2), lambda i: (0, 0)),        # b2
                pl.BlockSpec((H2, N_PAD), lambda i: (0, 0)),    # w3 (lane-padded)
                pl.BlockSpec((1, N_CLS), lambda i: (0, 0)),     # b3
            ],
            out_specs=pl.BlockSpec((TB, N_CLS), lambda i: (i, 0)),
        ),
        compiler_params=pltpu.CompilerParams(
            dimension_semantics=("parallel",),
            vmem_limit_bytes=vmem_limit,
        ),
        cost_estimate=pl.CostEstimate(
            flops=flops, transcendentals=0, bytes_accessed=bytes_accessed),
    )(x2d, prepared["w1"], prepared["b1"], prepared["w2"], prepared["b2"],
      prepared["w3p"], prepared["b3"])

    return out


def init_params(key):
    """Deterministic parameter init matching nn.Linear shapes (out, in)."""
    ks = jax.random.split(key, 6)

    def uniform(k, shape, fan_in):
        bound = 1.0 / jnp.sqrt(fan_in)
        return jax.random.uniform(k, shape, jnp.float32, -bound, bound)

    return {
        "w1": uniform(ks[0], (H1, D_IN), D_IN),
        "b1": uniform(ks[1], (H1,), D_IN),
        "w2": uniform(ks[2], (H2, H1), H1),
        "b2": uniform(ks[3], (H2,), H1),
        "w3": uniform(ks[4], (N_CLS, H2), H2),
        "b3": uniform(ks[5], (N_CLS,), H2),
    }


def _reference_forward(x, params, dtype=jnp.float32):
    """Pure-JAX reference. dtype controls matmul-input precision so the
    kernel's bf16 numerics can be emulated exactly (accumulation stays f32)."""
    x2d = x.reshape(-1, D_IN).astype(jnp.float32)

    def lin(h, w, b):
        return jnp.dot(h.astype(dtype), w.T.astype(dtype),
                       preferred_element_type=jnp.float32) + b

    h1 = jnp.maximum(lin(x2d, params["w1"], params["b1"]), 0.0)
    h2 = jnp.maximum(lin(h1, params["w2"], params["b2"]), 0.0)
    return lin(h2, params["w3"], params["b3"])


if __name__ == "__main__":
    key = jax.random.PRNGKey(0)
    k_param, k_x, k_x2 = jax.random.split(key, 3)

    params = init_params(k_param)
    prepared = prepare_params(params)

    # Small batch of "MNIST-like" inputs, NCHW as the PyTorch module expects.
    x = jax.random.normal(k_x, (2, 1, 28, 28), dtype=jnp.float32)
    out = digit_classifier_forward(x, prepared)
    jax.block_until_ready(out)
    assert out.shape == (2, N_CLS), out.shape

    ref_bf16 = _reference_forward(x, params, dtype=jnp.bfloat16)
    assert jnp.allclose(out, ref_bf16, atol=1e-3, rtol=1e-3), \
        "mismatch vs bf16-emulated reference"
    ref_f32 = _reference_forward(x, params, dtype=jnp.float32)
    assert jnp.allclose(out, ref_f32, atol=5e-2, rtol=5e-2), \
        "mismatch vs f32 reference"

    # Exercise the multi-step grid + ragged last tile (B=37 -> 2 steps of 24).
    x2 = jax.random.normal(k_x2, (37, 1, 28, 28), dtype=jnp.float32)
    out2 = digit_classifier_forward(x2, prepared)
    jax.block_until_ready(out2)
    assert out2.shape == (37, N_CLS), out2.shape
    ref2 = _reference_forward(x2, params, dtype=jnp.bfloat16)
    assert jnp.allclose(out2, ref2, atol=1e-3, rtol=1e-3), \
        "mismatch on ragged-tile batch"

    print("KERNEL_OK")
</pallas_src>

<mosaic_0001>
module attributes {stable_mosaic.version = 11 : i64} {
  func.func @_mlp_kernel(%arg0: i32, %arg1: memref<8x784xf32, #tpu.memory_space<vmem>>, %arg2: memref<784x128xbf16, #tpu.memory_space<vmem>>, %arg3: memref<1x128xf32, #tpu.memory_space<vmem>>, %arg4: memref<128x64xbf16, #tpu.memory_space<vmem>>, %arg5: memref<1x64xf32, #tpu.memory_space<vmem>>, %arg6: memref<64x128xbf16, #tpu.memory_space<vmem>>, %arg7: memref<1x10xf32, #tpu.memory_space<vmem>>, %arg8: memref<8x10xf32, #tpu.memory_space<vmem>>) attributes {dimension_semantics = [#tpu.dimension_semantics<parallel>], iteration_bounds = array<i64: 1>, scalar_prefetch = 0 : i64, scratch_operands = 0 : i64, tpu.core_type = #tpu.core_type<tc>, window_params = [{transform_indices = @transform_0, window_bounds = array<i64: 8, 784>}, {pipeline_mode = #tpu.pipeline_mode<synchronous>, transform_indices = @transform_1, window_bounds = array<i64: 784, 128>}, {pipeline_mode = #tpu.pipeline_mode<synchronous>, transform_indices = @transform_2, window_bounds = array<i64: 1, 128>}, {pipeline_mode = #tpu.pipeline_mode<synchronous>, transform_indices = @transform_3, window_bounds = array<i64: 128, 64>}, {pipeline_mode = #tpu.pipeline_mode<synchronous>, transform_indices = @transform_4, window_bounds = array<i64: 1, 64>}, {pipeline_mode = #tpu.pipeline_mode<synchronous>, transform_indices = @transform_5, window_bounds = array<i64: 64, 128>}, {pipeline_mode = #tpu.pipeline_mode<synchronous>, transform_indices = @transform_6, window_bounds = array<i64: 1, 10>}, {transform_indices = @transform_7, window_bounds = array<i64: 8, 10>}]} {
    %c0 = arith.constant 0 : index
    %c0_0 = arith.constant 0 : index
    %0 = vector.load %arg1[%c0, %c0_0] : memref<8x784xf32, #tpu.memory_space<vmem>>, vector<8x784xf32>
    %1 = arith.truncf %0 : vector<8x784xf32> to vector<8x784xbf16>
    %c0_1 = arith.constant 0 : index
    %c0_2 = arith.constant 0 : index
    %2 = vector.load %arg2[%c0_1, %c0_2] : memref<784x128xbf16, #tpu.memory_space<vmem>>, vector<784x128xbf16>
    %cst = arith.constant dense<0.000000e+00> : vector<8x128xf32>
    %3 = tpu.matmul %1, %2, %cst {dimension_numbers = #tpu.dot_dimension_numbers<[1], [0], [0], [1], [0, 0, 1, 1], [], []>} : vector<8x784xbf16>, vector<784x128xbf16>, vector<8x128xf32> -> vector<8x128xf32>
    %c0_3 = arith.constant 0 : index
    %c0_4 = arith.constant 0 : index
    %4 = vector.load %arg3[%c0_3, %c0_4] : memref<1x128xf32, #tpu.memory_space<vmem>>, vector<1x128xf32>
    %5 = vector.broadcast %4 : vector<1x128xf32> to vector<8x128xf32>
    %6 = arith.addf %3, %5 : vector<8x128xf32>
    %cst_5 = arith.constant 0.000000e+00 : f32
    %7 = vector.broadcast %cst_5 : f32 to vector<8x128xf32>
    %8 = arith.maximumf %6, %7 : vector<8x128xf32>
    %9 = arith.truncf %8 : vector<8x128xf32> to vector<8x128xbf16>
    %c0_6 = arith.constant 0 : index
    %c0_7 = arith.constant 0 : index
    %10 = vector.load %arg4[%c0_6, %c0_7] : memref<128x64xbf16, #tpu.memory_space<vmem>>, vector<128x64xbf16>
    %cst_8 = arith.constant dense<0.000000e+00> : vector<8x64xf32>
    %11 = tpu.matmul %9, %10, %cst_8 {dimension_numbers = #tpu.dot_dimension_numbers<[1], [0], [0], [1], [0, 0, 1, 1], [], []>} : vector<8x128xbf16>, vector<128x64xbf16>, vector<8x64xf32> -> vector<8x64xf32>
    %c0_9 = arith.constant 0 : index
    %c0_10 = arith.constant 0 : index
    %12 = vector.load %arg5[%c0_9, %c0_10] : memref<1x64xf32, #tpu.memory_space<vmem>>, vector<1x64xf32>
    %13 = vector.broadcast %12 : vector<1x64xf32> to vector<8x64xf32>
    %14 = arith.addf %11, %13 : vector<8x64xf32>
    %cst_11 = arith.constant 0.000000e+00 : f32
    %15 = vector.broadcast %cst_11 : f32 to vector<8x64xf32>
    %16 = arith.maximumf %14, %15 : vector<8x64xf32>
    %17 = arith.truncf %16 : vector<8x64xf32> to vector<8x64xbf16>
    %c0_12 = arith.constant 0 : index
    %c0_13 = arith.constant 0 : index
    %18 = vector.load %arg6[%c0_12, %c0_13] : memref<64x128xbf16, #tpu.memory_space<vmem>>, vector<64x128xbf16>
    %cst_14 = arith.constant dense<0.000000e+00> : vector<8x128xf32>
    %19 = tpu.matmul %17, %18, %cst_14 {dimension_numbers = #tpu.dot_dimension_numbers<[1], [0], [0], [1], [0, 0, 1, 1], [], []>} : vector<8x64xbf16>, vector<64x128xbf16>, vector<8x128xf32> -> vector<8x128xf32>
    %20 = vector.extract_strided_slice %19 {offsets = [0, 0], sizes = [8, 10], strides = [1, 1]} : vector<8x128xf32> to vector<8x10xf32>
    %c0_15 = arith.constant 0 : index
    %c0_16 = arith.constant 0 : index
    %21 = vector.load %arg7[%c0_15, %c0_16] : memref<1x10xf32, #tpu.memory_space<vmem>>, vector<1x10xf32>
    %22 = vector.broadcast %21 : vector<1x10xf32> to vector<8x10xf32>
    %23 = arith.addf %20, %22 : vector<8x10xf32>
    %c0_17 = arith.constant 0 : index
    %c0_18 = arith.constant 0 : index
    %24 = vector.load %arg8[%c0_17, %c0_18] : memref<8x10xf32, #tpu.memory_space<vmem>>, vector<8x10xf32>
    tpu.vector_store %arg8[%c0_17, %c0_18], %23 {strides = array<i32>} : memref<8x10xf32, #tpu.memory_space<vmem>>, vector<8x10xf32>,
    return
  }
  func.func @transform_0(%arg0: i32) -> (i32, i32) {
    %c0_i32 = arith.constant 0 : i32
    %c0_i32_0 = arith.constant 0 : i32
    return %arg0, %c0_i32 : i32, i32
  }
  func.func @transform_1(%arg0: i32) -> (i32, i32) {
    %c0_i32 = arith.constant 0 : i32
    %c0_i32_0 = arith.constant 0 : i32
    %c0_i32_1 = arith.constant 0 : i32
    return %c0_i32, %c0_i32_0 : i32, i32
  }
  func.func @transform_2(%arg0: i32) -> (i32, i32) {
    %c0_i32 = arith.constant 0 : i32
    %c0_i32_0 = arith.constant 0 : i32
    %c0_i32_1 = arith.constant 0 : i32
    return %c0_i32, %c0_i32_0 : i32, i32
  }
  func.func @transform_3(%arg0: i32) -> (i32, i32) {
    %c0_i32 = arith.constant 0 : i32
    %c0_i32_0 = arith.constant 0 : i32
    %c0_i32_1 = arith.constant 0 : i32
    return %c0_i32, %c0_i32_0 : i32, i32
  }
  func.func @transform_4(%arg0: i32) -> (i32, i32) {
    %c0_i32 = arith.constant 0 : i32
    %c0_i32_0 = arith.constant 0 : i32
    %c0_i32_1 = arith.constant 0 : i32
    return %c0_i32, %c0_i32_0 : i32, i32
  }
  func.func @transform_5(%arg0: i32) -> (i32, i32) {
    %c0_i32 = arith.constant 0 : i32
    %c0_i32_0 = arith.constant 0 : i32
    %c0_i32_1 = arith.constant 0 : i32
    return %c0_i32, %c0_i32_0 : i32, i32
  }
  func.func @transform_6(%arg0: i32) -> (i32, i32) {
    %c0_i32 = arith.constant 0 : i32
    %c0_i32_0 = arith.constant 0 : i32
    %c0_i32_1 = arith.constant 0 : i32
    return %c0_i32, %c0_i32_0 : i32, i32
  }
  func.func @transform_7(%arg0: i32) -> (i32, i32) {
    %c0_i32 = arith.constant 0 : i32
    %c0_i32_0 = arith.constant 0 : i32
    return %arg0, %c0_i32 : i32, i32
  }
}

</mosaic_0001>

<bundles_post_ra>
// kernel: tpu_custom_call.1
= control target key start
LH: loop header
LB: loop body
LE: loop exit
PB: predicated region body
PF: predicated region fallthrough
CT: control target
= control target key end

     0   :  { %12 = vsyncpa [#allocation3], 0  ;;  %s1390_s0 = inlined_call_operand.vmem [shape: f32[2,784], index: 0, kind: input, shape index: {}]   ;;  %s1391_s1 = inlined_call_operand.hbm [shape: bf16[784,128], index: 1, kind: input, shape index: {}]   ;;  %s1392_s2 = inlined_call_operand.vmem [shape: f32[1,128], index: 2, kind: input, shape index: {}]   ;;  %s1393_s3 = inlined_call_operand.vmem [shape: bf16[128,64], index: 3, kind: input, shape index: {}]   ;;  %s1394_s4 = inlined_call_operand.vmem [shape: f32[1,64], index: 4, kind: input, shape index: {}]   ;;  %s1395_s5 = inlined_call_operand.vmem [shape: bf16[64,128], index: 5, kind: input, shape index: {}]   ;;  %s1396_s6 = inlined_call_operand.vmem [shape: f32[1,10], index: 6, kind: input, shape index: {}]   ;;  %s1397_s7 = inlined_call_operand.hbm [shape: f32[2,10], index: 7, kind: output, shape index: {}]  }
   0x1   :  { %13 = vsyncpa [#allocation4], 0  ;;  %s1236_s24 = smov [#allocation2]  }
   0x2   :  { %s21_s25 = sshll.u32 %s1236_s24, 4  ;;  %s22_s25 = int_to_ptr.vmem [resolvable:$true] %s21_s25 }
   0x3   :  { %s1200_s26 = scalar_lea.vmem %s22_s25, 6272  ;;  %p1205_p1 = scmp.lt.s32.totalorder %s22_s25, %s22_s25 }
   0x4   :  { %p1201_p0 = scmp.ne.s32.totalorder %s22_s25, %s1200_s26  ;;  %p1206_p2 = scmp.lt.s32.totalorder %s1200_s26, %s1200_s26 }
   0x6   :  { %p1207_p3 = por %p1206_p2, %p1205_p1 }
   0x8   :  { %p1208_p4 = pnand %p1207_p3, %p1201_p0 }
   0xa   :  { %1211 = shalt.err (!%p1208_p4)
}
   0xb   :  { %s1237_s27 = smov 64   ;;  %s1238_s28 = smov 4  }
   0xc   :  { %27 = dma.hbm_to_vmem [thread:$0]  %s1391_s1, 6272, %s22_s25, [#allocation3], %s1237_s27, %s1237_s27, %s1238_s28  }
   0xd   :  { %1232 = dma.done.wait [#allocation3], 6272  }
   0xe   :  { %1233 = vsyncadd [#allocation3], 4294961024  ;;  %v1119_v0 = vld [vmem:[#allocation2 + $0x78] sm:$0xff]   ;;  %v1123_v4 = vld [vmem:[#allocation2 + $0x70] sm:$0xff]   ;;  %v1239_v23 = vmov 1983009808   ;;  %v65_v25 = vlaneseq }
   0xf   :  { %v1120_v1 = vld [vmem:[#allocation2 + $0x38] sm:$0xff]   ;;  %990 = vmatprep.subr.bf16.mxu0 %v1119_v0  ;;  %v1124_v5 = vld [vmem:[#allocation2 + $0x30] sm:$0xff]   ;;  %v1127_v8 = vld [vmem:[#allocation2 + $0x68] sm:$0xff]   ;;  %v63_v24 = vunpack.c.l.s4 %v1239_v23  ;;  %v1240_v47 = vmov 0.0   ;;  %vm1241_vm0 = vmmov 0   ;;  %vm542_vm1 = vcmask 130048  }
  0x10   :  { %v1121_v2 = vld [vmem:[#allocation2 + $0xf8] sm:$0xff]   ;;  %991 = vmatpush3.bf16.msra.mxu0 %v1120_v1  ;;  %v1125_v6 = vld [vmem:[#allocation2 + $0xf0] sm:$0xff]   ;;  %v1128_v9 = vld [vmem:[#allocation2 + $0x28] sm:$0xff]   ;;  %v66_v31 = vshrl.u32 %v65_v25, 7  ;;  %vm853_vm2 = vcmask 523264   ;;  %vm905_vm3 = vcmask 80896  }
  0x11   :  { %v1122_v3 = vld [vmem:[#allocation2 + $0xb8] sm:$0xff]   ;;  %1012 = vmatprep.subr.bf16.mxu1 %v1121_v2  ;;  %992 = vmatprep.subr.bf16.mxu0 %v1123_v4  ;;  %v1126_v7 = vld [vmem:[#allocation2 + $0xb0] sm:$0xff]   ;;  %v1129_v10 = vld [vmem:[#allocation2 + $0xe8] sm:$0xff]   ;;  %v64_v30 = vunpack.c.0.s8 %v63_v24 }
  0x12   :  { %1013 = vmatpush3.bf16.msra.mxu1 %v1122_v3  ;;  %v1130_v11 = vld [vmem:[#allocation2 + $0xa8] sm:$0xff]   ;;  %v1131_v12 = vld [vmem:[#allocation2 + $0x60] sm:$0xff]   ;;  %v1135_v16 = vld [vmem:[#allocation2 + $0x58] sm:$0xff]  }
  0x13   :  { %1014 = vmatprep.subr.bf16.mxu1 %v1125_v6  ;;  %v1132_v13 = vld [vmem:[#allocation2 + $0x20] sm:$0xff]   ;;  %v1136_v17 = vld [vmem:[#allocation2 + $0x18] sm:$0xff]   ;;  %v1139_v20 = vld [vmem:[#allocation2 + $0x50] sm:$0xff]   ;;  %v1288_v36 = vsub.s32 %v64_v30, %v66_v31 }
  0x14   :  { %993 = vmatpush3.bf16.msra.mxu0 %v1124_v5  ;;  %v1133_v14 = vld [vmem:[#allocation2 + $0xe0] sm:$0xff]   ;;  %v1137_v18 = vld [vmem:[#allocation2 + $0xd8] sm:$0xff]   ;;  %v1140_v21 = vld [vmem:[#allocation2 + $0x10] sm:$0xff]  }
  0x15   :  { %994 = vmatprep.subr.bf16.mxu0 %v1127_v8  ;;  %v1134_v15 = vld [vmem:[#allocation2 + $0xa0] sm:$0xff]   ;;  %v1138_v19 = vld [vmem:[#allocation2 + $0x98] sm:$0xff]   ;;  %v1141_v22 = vld [vmem:[#allocation2 + $0xd0] sm:$0xff]  }
  0x16   :  { %1015 = vmatpush3.bf16.msra.mxu1 %v1126_v7  ;;  %v1142_v26 = vld [vmem:[#allocation2 + $0x90] sm:$0xff]   ;;  %v1143_v27 = vld [vmem:[#allocation2 + $0x48] sm:$0xff]   ;;  %v1147_v33 = vld [vmem:[#allocation2 + $0x40] sm:$0xff]  }
  0x17   :  { %1016 = vmatprep.subr.bf16.mxu1 %v1129_v10  ;;  %v1144_v28 = vld [vmem:[#allocation2 + $0x8] sm:$0xff]   ;;  %v1148_v34 = vld [vmem:[#allocation2] sm:$0xff]   ;;  %v1155_v42 = vld [vmem:[#allocation2 + $0x178] sm:$0xff]  }
  0x18   :  { %995 = vmatpush3.bf16.msra.mxu0 %v1128_v9  ;;  %v1145_v29 = vld [vmem:[#allocation2 + $0xc8] sm:$0xff]   ;;  %v1149_v35 = vld [vmem:[#allocation2 + $0xc0] sm:$0xff]   ;;  %v1158_v52 = vld [vmem:[#allocation2 + $0x138] sm:$0xff]  }
  0x19   :  { %996 = vmatprep.subr.bf16.mxu0 %v1131_v12  ;;  %v1146_v32 = vld [vmem:[#allocation2 + $0x88] sm:$0xff]   ;;  %v1154_v39 = vld [vmem:[#allocation2 + $0x80] sm:$0xff]   ;;  %v1159_v55 = vld [vmem:[#allocation2 + $0x170] sm:$0xff]  }
  0x1a   :  { %1017 = vmatpush3.bf16.msra.mxu1 %v1130_v11  ;;  %v1150_v37 = vld [vmem:[%s1390_s0] ss:$14 sps:$4 sm:$0xff]   ;;  %v1152_v38 = vld [vmem:[%s1390_s0 + $0x1c] ss:$14 sps:$4 sm:$0xff]   ;;  %v1156_v43 = vld [vmem:[%s1390_s0 + $0x4] ss:$14 sps:$4 sm:$0xff]  }
  0x1b   :  { %1018 = vmatprep.subr.bf16.mxu1 %v1133_v14  ;;  %v68_v40 = vrot.slane %v1150_v37, %v1288_v36  ;;  %v82_v41 = vrot.slane %v1152_v38, %v1288_v36  ;;  %v1157_v44 = vld [vmem:[%s1390_s0 + $0x20] ss:$14 sps:$4 sm:$0xff]   ;;  %v75_v48 = vrot.slane %v1156_v43, %v1288_v36  ;;  %v1165_v63 = vld [vmem:[#allocation2 + $0x158] sm:$0xff]   ;;  %v1177_v5 = vld [vmem:[%s1390_s0 + $0x24] ss:$14 sps:$4 sm:$0xff]  }
  0x1c   :  { %997 = vmatpush3.bf16.msra.mxu0 %v1132_v13  ;;  %v89_v49 = vrot.slane %v1157_v44, %v1288_v36  ;;  %v1160_v58 = vld [vmem:[#allocation2 + $0x130] sm:$0xff]   ;;  %v1161_v59 = vld [vmem:[#allocation2 + $0x168] sm:$0xff]   ;;  %v1163_v61 = vld [vmem:[#allocation2 + $0x160] sm:$0xff]   ;;  %v118_v10 = vrot.slane %v1177_v5, %v1288_v36 }
  0x1d   :  { %998 = vmatprep.subr.bf16.mxu0 %v1135_v16  ;;  %v91_v45 = vcombine.high %v68_v40, %v82_v41  ;;  %v90_v46 = vcombine.low %v68_v40, %v82_v41  ;;  %v1162_v60 = vld [vmem:[#allocation2 + $0x128] sm:$0xff]   ;;  %v1164_v62 = vld [vmem:[#allocation2 + $0x120] sm:$0xff]   ;;  %v1166_v1 = vld [vmem:[#allocation2 + $0x118] sm:$0xff]  }
  0x1e   :  { %1019 = vmatpush3.bf16.msra.mxu1 %v1134_v15  ;;  %v93_v53 = vcombine.high %v75_v48, %v89_v49  ;;  %v92_v54 = vcombine.low %v75_v48, %v89_v49  ;;  %v1173_v0 = vld [vmem:[#allocation2 + $0x180] sm:$0xff]   ;;  %v1174_v2 = vld [vmem:[%s1390_s0 + $0x8] ss:$14 sps:$4 sm:$0xff]   ;;  %v1176_v3 = vld [vmem:[%s1390_s0 + $0xc] ss:$14 sps:$4 sm:$0x33]  }
  0x1f   :  { %1020 = vmatprep.subr.bf16.mxu1 %v1137_v18  ;;  %v137_v50 = vpack.c.bf16 %v91_v45, %v91_v45  ;;  %v136_v51 = vpack.c.bf16 %v90_v46, %v90_v46  ;;  %v1167_v4 = vld [vmem:[#allocation2 + $0x150] sm:$0xff]   ;;  %v104_v7 = vrot.slane %v1174_v2, %v1288_v36  ;;  %v111_v8 = vrot.slane %v1176_v3, %v1288_v36  ;;  %v1169_v12 = vld [vmem:[#allocation2 + $0x148] sm:$0xff]   ;;  %v1171_v18 = vld [vmem:[#allocation2 + $0x140] sm:$0xff]  }
  0x20   :  { %999 = vmatpush3.bf16.msra.mxu0 %v1136_v17  ;;  %v139_v56 = vpack.c.bf16 %v93_v53, %v93_v53  ;;  %v138_v57 = vpack.c.bf16 %v92_v54, %v92_v54  ;;  %v1179_v6 = vld [vmem:[%s1390_s0 + $0x28] ss:$14 sps:$4 sm:$0x33]   ;;  %v1183_v25 = vld [vmem:[%s1393_s3 + $0x20] sm:$0xff]   ;;  %v1188_v30 = vld [vmem:[%s1395_s5 + $0x18] sm:$0xff]  }
  0x21   :  { %1000 = vmatprep.subr.bf16.mxu0 %v1139_v20  ;;  %578 = vmatprep.mubr.bf16.mxu0 %v137_v50  ;;  %v1168_v9 = vld [vmem:[#allocation2 + $0x110] sm:$0xff]   ;;  %v125_v11 = vrot.slane %v1179_v6, %v1288_v36  ;;  %v127_v13 = vcombine.high %v104_v7, %v118_v10  ;;  %v1170_v15 = vld [vmem:[#allocation2 + $0x108] sm:$0xff]   ;;  %v1172_v20 = vld [vmem:[#allocation2 + $0x100] sm:$0xff]  }
  0x22   :  { %1021 = vmatpush3.bf16.msra.mxu1 %v1138_v19  ;;  %618 = vmatprep.mubr.bf16.mxu1 %v139_v56  ;;  %v126_v19 = vcombine.low %v104_v7, %v118_v10  ;;  %v1181_v23 = vld [vmem:[%s1393_s3 + $0x30] sm:$0xff]   ;;  %v1182_v24 = vld [vmem:[%s1393_s3 + $0x28] sm:$0xff]   ;;  %v924_v44 = vld [vmem:[%s1392_s2] ss:$0 sm:$0xff] }
  0x23   :  { %1022 = vmatprep.subr.bf16.mxu1 %v1141_v22  ;;  %v128_v14 = vcombine.low %v111_v8, %v125_v11  ;;  %v141_v16 = vpack.c.bf16 %v127_v13, %v127_v13  ;;  %v1180_v22 = vld [vmem:[%s1393_s3 + $0x38] sm:$0xff]   ;;  %v1189_v31 = vld [vmem:[%s1395_s5 + $0x10] sm:$0xff]  }
  0x24   :  { %1001 = vmatpush3.bf16.msra.mxu0 %v1140_v21  ;;  %v140_v21 = vpack.c.bf16 %v126_v19, %v126_v19 }
  0x25   :  { %1002 = vmatprep.subr.bf16.mxu0 %v1143_v27  ;;  %v142_v17 = vpack.c.bf16 %v128_v14, %v128_v14  ;;  %v1185_v27 = vld [vmem:[%s1393_s3 + $0x10] sm:$0xff]  }
  0x26   :  { %1023 = vmatpush3.bf16.msra.mxu1 %v1142_v26  ;;  %v1184_v26 = vld [vmem:[%s1393_s3 + $0x18] sm:$0xff]  }
  0x27   :  { %1024 = vmatprep.subr.bf16.mxu1 %v1145_v29  ;;  %v1187_v29 = vld [vmem:[%s1393_s3] sm:$0xff]  }
  0x28   :  { %1003 = vmatpush3.bf16.msra.mxu0 %v1144_v28  ;;  %v1186_v28 = vld [vmem:[%s1393_s3 + $0x8] sm:$0xff]  }
  0x29   :  { %1004 = vmatprep.subr.bf16.mxu0 %v1147_v33 }
  0x2a   :  { %1025 = vmatpush3.bf16.msra.mxu1 %v1146_v32 }
  0x2b   :  { %1026 = vmatprep.subr.bf16.mxu1 %v1149_v35 }
  0x2c   :  { %1005 = vmatpush3.bf16.msra.mxu0 %v1148_v34 }
  0x2d   :  { %1034 = vmatprep.subr.bf16.mxu0 %v1155_v42 }
  0x2e   :  { %1027 = vmatpush3.bf16.msra.mxu1 %v1154_v39 }
  0x2f   :  { %1072 = vmatprep.subr.bf16.mxu1 %v1240_v47  ;;  %579 = vmatmul.mubr.bf16.vlgmr.msra.gmra.mxu0 %v136_v51 }
  0x30   :  { %1035 = vmatpush3.bf16.msra.mxu0 %v1158_v52  ;;  %658 = vmatprep.mubr.bf16.mxu0 %v141_v16 }
  0x31   :  { %1036 = vmatprep.subr.bf16.mxu0 %v1159_v55  ;;  %619 = vmatmul.mubr.bf16.vlgmr.msra.gmra.mxu1 %v138_v57 }
  0x32   :  { %1074 = vmatprep.mubr.msk.bf16.mxu1 %vm1241_vm0, %v1240_v47  ;;  %1073 = vmatpush3.bf16.msra.mxu1 %v1173_v0 }
  0x33   :  { %1078 = vmatprep.subr.bf16.mxu1 %v1240_v47 }
  0x34   :  { %1037 = vmatpush3.bf16.msra.mxu0 %v1160_v58 }
  0x35   :  { %1038 = vmatprep.subr.bf16.mxu0 %v1161_v59  ;;  %v1190_v59 = vld [vmem:[%s1395_s5 + $0x8] sm:$0xff]  }
  0x38   :  { %1039 = vmatpush3.bf16.msra.mxu0 %v1162_v60  ;;  %v1191_v60 = vld [vmem:[%s1395_s5] sm:$0xff]  }
  0x39   :  { %1040 = vmatprep.subr.bf16.mxu0 %v1163_v61  ;;  %1075 = vmatmul.mubr.msk.bf16.vlgmr.msra.gmra.mxu1 %vm542_vm1, %v142_v17  ;;  %v975_v61 = vld [vmem:[%s1394_s4] ss:$0 sm:$0xff] }
  0x3a   :  { %1094 = vmatprep.mubr.msk.bf16.mxu1 %vm1241_vm0, %v1240_v47  ;;  %1079 = vmatpush3.bf16.msra.mxu1 %v1180_v22 }
  0x3b   :  { %1080 = vmatprep.subr.bf16.mxu1 %v1240_v47 }
  0x3c   :  { %1041 = vmatpush3.bf16.msra.mxu0 %v1164_v62 }
  0x3d   :  { %1042 = vmatprep.subr.bf16.mxu0 %v1165_v63 }
  0x3e   :  { %1081 = vmatpush3.bf16.msra.mxu1 %v1181_v23 }
  0x3f   :  { %1082 = vmatprep.subr.bf16.mxu1 %v1240_v47 }
  0x40   :  { %1043 = vmatpush3.bf16.msra.mxu0 %v1166_v1 }
  0x41   :  { %1044 = vmatprep.subr.bf16.mxu0 %v1167_v4 }
  0x42   :  { %1083 = vmatpush3.bf16.msra.mxu1 %v1182_v24 }
  0x43   :  { %1084 = vmatprep.subr.bf16.mxu1 %v1240_v47 }
  0x44   :  { %1045 = vmatpush3.bf16.msra.mxu0 %v1168_v9 }
  0x45   :  { %1046 = vmatprep.subr.bf16.mxu0 %v1169_v12 }
  0x46   :  { %1085 = vmatpush3.bf16.msra.mxu1 %v1183_v25 }
  0x47   :  { %1086 = vmatprep.subr.bf16.mxu1 %v1240_v47 }
  0x48   :  { %1047 = vmatpush3.bf16.msra.mxu0 %v1170_v15 }
  0x49   :  { %1048 = vmatprep.subr.bf16.mxu0 %v1171_v18 }
  0x4a   :  { %1087 = vmatpush3.bf16.msra.mxu1 %v1184_v26 }
  0x4b   :  { %1088 = vmatprep.subr.bf16.mxu1 %v1240_v47 }
  0x4c   :  { %1049 = vmatpush3.bf16.msra.mxu0 %v1172_v20 }
  0x4d   :  { %1098 = vmatprep.subr.bf16.mxu0 %v1240_v47 }
  0x4e   :  { %1089 = vmatpush3.bf16.msra.mxu1 %v1185_v27 }
  0x4f   :  { %659 = vmatmul.mubr.bf16.vlgmr.msra.gmra.mxu0 %v140_v21  ;;  %1090 = vmatprep.subr.bf16.mxu1 %v1240_v47 }
  0x50   :  { %1106 = vmatprep.mubr.msk.bf16.mxu0 %vm1241_vm0, %v1240_v47  ;;  %1099 = vmatpush3.bf16.msra.mxu0 %v1188_v30 }
  0x51   :  { %1100 = vmatprep.subr.bf16.mxu0 %v1240_v47 }
  0x52   :  { %1091 = vmatpush3.bf16.msra.mxu1 %v1186_v28 }
  0x53   :  { %1092 = vmatprep.subr.bf16.mxu1 %v1240_v47 }
  0x54   :  { %1101 = vmatpush3.bf16.msra.mxu0 %v1189_v31 }
  0x55   :  { %1102 = vmatprep.subr.bf16.mxu0 %v1240_v47 }
  0x56   :  { %1093 = vmatpush3.bf16.msra.mxu1 %v1187_v29 }
  0x58   :  { %1103 = vmatpush3.bf16.msra.mxu0 %v1190_v59 }
  0x59   :  { %1104 = vmatprep.subr.bf16.mxu0 %v1240_v47  ;;  %v989_v47 = vld [vmem:[%s1396_s6] ss:$0 sm:$0xff] }
  0x5c   :  { %1105 = vmatpush3.bf16.msra.mxu0 %v1191_v60 }
  0xef   :  { %v1006_v32 = vpop.f32.mrf.mxu0 }
  0xf1   :  { %v1007_v33 = vpop.f32.mrf.mxu0  ;;  %v1028_v34 = vpop.f32.mrf.mxu1 }
  0xf2   :  { %v1008_v43 = vadd.f32 %v1007_v33, %v1006_v32 }
  0xf3   :  { %v1009_v35 = vpop.f32.mrf.mxu0  ;;  %v1029_v36 = vpop.f32.mrf.mxu1 }
  0xf4   :  { %v581_v46 = vadd.f32 %v1008_v43, %v924_v44  ;;  %v1030_v48 = vadd.f32 %v1029_v36, %v1028_v34 }
  0xf5   :  { %v1010_v37 = vpop.f32.mrf.mxu0  ;;  %v1031_v38 = vpop.f32.mrf.mxu1 }
  0xf6   :  { %v621_v51 = vadd.f32 %v1030_v48, %v581_v46 }
  0xf7   :  { %v1032_v39 = vpop.f32.mrf.mxu1 }
  0xf9   :  { %v700_v40 = vpop.f32.mrf.mxu1 }
  0xfb   :  { %v1076_v41 = vpop.f32.mrf.mxu1 }
  0xfd   :  { %v703_v42 = vpop.f32.mrf.mxu1 }
  0xff   :  { %v1077_v45 = vpop.f32.mrf.mxu1 }
 0x10f   :  { %v1050_v49 = vpop.f32.mrf.mxu0 }
 0x111   :  { %v1051_v50 = vpop.f32.mrf.mxu0 }
 0x112   :  { %v1052_v52 = vadd.f32 %v1051_v50, %v1050_v49 }
 0x113   :  { %v1053_v53 = vpop.f32.mrf.mxu0 }
 0x114   :  { %v661_v54 = vadd.f32 %v1052_v52, %v621_v51 }
 0x115   :  { %v1054_v55 = vpop.f32.mrf.mxu0 }
 0x116   :  { %v701_v56 = vadd.f32 %v700_v40, %v661_v54 }
 0x118   :  { %v706_v57 = vmax.f32 %v701_v56, 0.0 }
 0x11a   :  { %v707_v58 = vpack.c.bf16 %v706_v57, %v706_v57 }
 0x11c   :  { %1095 = vmatmul.mubr.bf16.vlgmr.msra.gmra.mxu1 %v707_v58 }
 0x1dc   :  { %v813_v62 = vpop.f32.mrf.mxu1 }
 0x1dd   :  { %v814_v63 = vadd.f32 %v975_v61, %v813_v62 }
 0x1de   :  { %v1096_v0 = vpop.f32.mrf.mxu1 }
 0x1df   :  { %v819_v1 = vmax.f32 %v814_v63, 0.0 }
 0x1e0   :  { %v816_v2 = vpop.f32.mrf.mxu1 }
 0x1e1   :  { %v820_v3 = vpack.c.bf16 %v819_v1, %v819_v1 }
 0x1e2   :  { %v1097_v4 = vpop.f32.mrf.mxu1 }
 0x1e3   :  { %1107 = vmatmul.mubr.msk.bf16.vlgmr.msra.gmra.mxu0 %vm853_vm2, %v820_v3 }
 0x2a3   :  { %v891_v5 = vpop.f32.mrf.mxu0 }
 0x2a4   :  { %v904_v6 = vadd.f32 %v989_v47, %v891_v5 }
 0x2a5   :  { %v1108_v7 = vpop.f32.mrf.mxu0 }
 0x2a6   :  { %906 = vst.msk [vmem:[#allocation5] sm:$0xff] %vm905_vm3, %v904_v6 }
 0x2a7   :  { %v894_v8 = vpop.f32.mrf.mxu0 }
 0x2a9   :  { %v1109_v9 = vpop.f32.mrf.mxu0 }
 0x2aa   :  { %911 = vsyncadd [#allocation4], 96  ;;  %s1242_s4 = smov [#allocation5]  }
 0x2ab   :  { %s912_s5 = sshll.u32 %s1242_s4, 4  ;;  %s913_s5 = int_to_ptr.vmem [resolvable:$true] %s912_s5 }
 0x2ac   :  { %s1212_s25 = scalar_lea.vmem %s913_s5, 32  ;;  %s1216_s26 = scalar_lea.vmem %s913_s5, 128 }
 0x2ad   :  { %p1213_p5 = scmp.ne.s32.totalorder %s913_s5, %s1212_s25  ;;  %p1217_p6 = scmp.lt.s32.totalorder %s913_s5, %s913_s5 }
 0x2ae   :  { %p1218_p7 = scmp.lt.s32.totalorder %s1216_s26, %s1212_s25 }
 0x2b0   :  { %p1219_p8 = por %p1218_p7, %p1217_p6 }
 0x2b2   :  { %p1220_p9 = pnand %p1219_p8, %p1213_p5 }
 0x2b4   :  { %1223 = shalt.err (!%p1220_p9)
}
 0x2b5   :  { %s1243_s6 = smov 32   ;;  %s1244_s27 = smov 2  }
 0x2b6   :  { %918 = dma.vmem_to_hbm [thread:$0]  %s913_s5, 32, %s1397_s7, [#allocation4], %s1243_s6, %s1243_s6, %s1244_s27  }
 0x2b7   :  { %1234 = dma.done.wait [#allocation4], 128  }
 0x2b8   :  { %1235 = vsyncadd [#allocation4], 4294967168 }
 0x2b9   :  { %922 = vsyncpa [#allocation3], 1 }
 0x2ba   :  { %923 = vsyncpa [#allocation4], 1 }

</bundles_post_ra>
